<compile_context>
chip_gen: v5e
topology: v5e:2x2
jax: 0.10.0
libtpu: 0.0.40
codegen_flags: <defaults>
</compile_context>

<pallas_src>
from functools import partial

import jax
import jax.numpy as jnp
from jax.experimental import pallas as pl
from jax.experimental.pallas import tpu as pltpu


def _mlp_kernel(x_ref, w1_ref, b1_ref, w2_ref, b2_ref, w3_ref, b3_ref, o_ref,
                *, compute_dtype):
    """One batch tile.

    x_ref: [tb, in] f32 (native layout, streamed, read from HBM once).
    Weights are PyTorch-native [out, in] (compute_dtype); biases [out, 1] f32.
    Activations are kept as [features, tb] so batch sits on the lane axis.
    """
    x_c = x_ref[...].astype(compute_dtype)

    # fc1 + relu: contract the `in` axis of both operands -> [50, tb].
    # (NT contraction; the small in-kernel relayout of x uses the XLU slot,
    #  which has slack — far cheaper than a wrapper-side HBM transpose.)
    h1 = jax.lax.dot_general(
        w1_ref[...], x_c, (((1,), (1,)), ((), ())),
        preferred_element_type=jnp.float32)
    h1 = jnp.maximum(h1 + b1_ref[...], 0.0)

    # fc2 + relu: [25, 50] @ [50, tb] -> [25, tb]   (f32 accumulation)
    h2 = jnp.dot(w2_ref[...], h1.astype(compute_dtype),
                 preferred_element_type=jnp.float32)
    h2 = jnp.maximum(h2 + b2_ref[...], 0.0)

    # fc3: [1, 25] @ [25, tb] -> [1, tb]   (lane-dense output row)
    out = jnp.dot(w3_ref[...], h2.astype(compute_dtype),
                  preferred_element_type=jnp.float32)
    o_ref[...] = (out + b3_ref[...]).astype(o_ref.dtype)


def _round_up(n, m):
    return ((n + m - 1) // m) * m


def _choose_batch_tile(B, block_b):
    """Lane-aligned batch tile.

    Capped by block_b, and additionally capped to ~B/4 so large batches get at
    least ~4 grid steps (pipeline depth + v7x two-TensorCore sharding).
    """
    tb = min(block_b, _round_up(B, 128))
    tb = min(tb, max(128, _round_up(pl.cdiv(B, 4), 128)))
    return max(128, tb)


def price_predictor_forward(x, params, *, block_b=8192, use_bf16=True):
    """x: [B, input_size] float32 -> [B, 1] float32."""
    w1, b1 = params["w1"], params["b1"]   # [50, in], [50, 1]
    w2, b2 = params["w2"], params["b2"]   # [25, 50], [25, 1]
    w3, b3 = params["w3"], params["b3"]   # [1, 25],  [1, 1]

    B, in_size = x.shape
    tb = _choose_batch_tile(B, block_b)
    grid = (pl.cdiv(B, tb),)              # ragged tail handled by partial blocks

    compute_dtype = jnp.bfloat16 if use_bf16 else jnp.float32
    w1c = w1.astype(compute_dtype)        # weights ~12 KiB: cast once, stay resident
    w2c = w2.astype(compute_dtype)
    w3c = w3.astype(compute_dtype)

    param_bytes = sum(int(a.size) * a.dtype.itemsize
                      for a in (w1, b1, w2, b2, w3, b3))
    cost = pl.CostEstimate(
        flops=2 * B * (in_size * 50 + 50 * 25 + 25 * 1),
        transcendentals=0,
        bytes_accessed=B * in_size * 4 + B * 4 + param_bytes)

    resident = lambda i: (0, 0)           # same block every step -> stays in VMEM

    out_row = pl.pallas_call(
        partial(_mlp_kernel, compute_dtype=compute_dtype),
        out_shape=jax.ShapeDtypeStruct((1, B), jnp.float32),
        grid=grid,
        in_specs=[
            # x streamed over the batch axis in native [B, in] layout,
            # auto double-buffered by Pallas.
            pl.BlockSpec((tb, in_size), lambda i: (i, 0)),
            pl.BlockSpec(w1.shape, resident),
            pl.BlockSpec(b1.shape, resident),
            pl.BlockSpec(w2.shape, resident),
            pl.BlockSpec(b2.shape, resident),
            pl.BlockSpec(w3.shape, resident),
            pl.BlockSpec(b3.shape, resident),
        ],
        out_specs=pl.BlockSpec((1, tb), lambda i: (0, i)),
        compiler_params=pltpu.CompilerParams(
            dimension_semantics=("parallel",),   # batch tiles independent
            vmem_limit_bytes=32 * 1024 * 1024,   # ~12 MiB footprint at tb=8192
        ),
        cost_estimate=cost,
    )(x, w1c, b1, w2c, b2, w3c, b3)

    # Lane-dense (1, B) slab -> [B, 1].
    return out_row[0].reshape(B, 1)


def init_params(key, input_size):
    """Deterministic init matching PyTorch nn.Linear ([out, in] weights)."""
    ks = jax.random.split(key, 6)

    def uniform(k, shape, fan_in):
        bound = 1.0 / jnp.sqrt(fan_in)
        return jax.random.uniform(k, shape, jnp.float32, -bound, bound)

    return {
        "w1": uniform(ks[0], (50, input_size), input_size),
        "b1": uniform(ks[1], (50, 1), input_size),
        "w2": uniform(ks[2], (25, 50), 50),
        "b2": uniform(ks[3], (25, 1), 50),
        "w3": uniform(ks[4], (1, 25), 25),
        "b3": uniform(ks[5], (1, 1), 25),
    }


def _reference_forward_f32(x, p):
    h1 = jnp.maximum(x @ p["w1"].T + p["b1"][:, 0], 0.0)
    h2 = jnp.maximum(h1 @ p["w2"].T + p["b2"][:, 0], 0.0)
    return h2 @ p["w3"].T + p["b3"][:, 0]


def _reference_forward_bf16(x, p):
    # Matches the kernel's bf16 matmul operands with f32 accumulation.
    bf = jnp.bfloat16
    h1 = jnp.dot(x.astype(bf), p["w1"].astype(bf).T,
                 preferred_element_type=jnp.float32) + p["b1"][:, 0]
    h1 = jnp.maximum(h1, 0.0)
    h2 = jnp.dot(h1.astype(bf), p["w2"].astype(bf).T,
                 preferred_element_type=jnp.float32) + p["b2"][:, 0]
    h2 = jnp.maximum(h2, 0.0)
    return jnp.dot(h2.astype(bf), p["w3"].astype(bf).T,
                   preferred_element_type=jnp.float32) + p["b3"][:, 0]


if __name__ == "__main__":
    key = jax.random.PRNGKey(0)
    k_params, k_x = jax.random.split(key)

    batch = 8
    input_size = 32

    params = init_params(k_params, input_size)
    x = jax.random.normal(k_x, (batch, input_size), dtype=jnp.float32)

    fwd = jax.jit(partial(price_predictor_forward, block_b=8192))
    out = jax.block_until_ready(fwd(x, params))
    assert out.shape == (batch, 1)

    ref_bf = _reference_forward_bf16(x, params)
    ref_32 = _reference_forward_f32(x, params)
    assert jnp.allclose(out, ref_bf, atol=5e-3, rtol=5e-3), "mismatch vs bf16-matched ref"
    assert jnp.allclose(out, ref_32, atol=5e-2, rtol=5e-2), "mismatch vs f32 ref"

    # Full-f32 toggle (PyTorch-matching numerics; still one HBM pass over x).
    fwd32 = jax.jit(partial(price_predictor_forward, use_bf16=False))
    out32 = jax.block_until_ready(fwd32(x, params))
    assert out32.shape == (batch, 1)
    assert jnp.allclose(out32, ref_32, atol=1e-3, rtol=1e-3), "f32 path mismatch"

    print("KERNEL_OK")
</pallas_src>

<mosaic_0001>
module attributes {stable_mosaic.version = 11 : i64} {
  func.func @_mlp_kernel(%arg0: i32, %arg1: memref<128x32xf32, #tpu.memory_space<vmem>>, %arg2: memref<50x32xbf16, #tpu.memory_space<vmem>>, %arg3: memref<50x1xf32, #tpu.memory_space<vmem>>, %arg4: memref<25x50xbf16, #tpu.memory_space<vmem>>, %arg5: memref<25x1xf32, #tpu.memory_space<vmem>>, %arg6: memref<1x25xbf16, #tpu.memory_space<vmem>>, %arg7: memref<1x1xf32, #tpu.memory_space<vmem>>, %arg8: memref<1x128xf32, #tpu.memory_space<vmem>>) attributes {dimension_semantics = [#tpu.dimension_semantics<parallel>], iteration_bounds = array<i64: 1>, scalar_prefetch = 0 : i64, scratch_operands = 0 : i64, tpu.core_type = #tpu.core_type<tc>, window_params = [{transform_indices = @transform_0, window_bounds = array<i64: 128, 32>}, {pipeline_mode = #tpu.pipeline_mode<synchronous>, transform_indices = @transform_1, window_bounds = array<i64: 50, 32>}, {pipeline_mode = #tpu.pipeline_mode<synchronous>, transform_indices = @transform_2, window_bounds = array<i64: 50, 1>}, {pipeline_mode = #tpu.pipeline_mode<synchronous>, transform_indices = @transform_3, window_bounds = array<i64: 25, 50>}, {pipeline_mode = #tpu.pipeline_mode<synchronous>, transform_indices = @transform_4, window_bounds = array<i64: 25, 1>}, {pipeline_mode = #tpu.pipeline_mode<synchronous>, transform_indices = @transform_5, window_bounds = array<i64: 1, 25>}, {pipeline_mode = #tpu.pipeline_mode<synchronous>, transform_indices = @transform_6, window_bounds = array<i64: 1, 1>}, {transform_indices = @transform_7, window_bounds = array<i64: 1, 128>}]} {
    %c0 = arith.constant 0 : index
    %c0_0 = arith.constant 0 : index
    %0 = vector.load %arg1[%c0, %c0_0] : memref<128x32xf32, #tpu.memory_space<vmem>>, vector<128x32xf32>
    %1 = arith.truncf %0 : vector<128x32xf32> to vector<128x32xbf16>
    %c0_1 = arith.constant 0 : index
    %c0_2 = arith.constant 0 : index
    %2 = vector.load %arg2[%c0_1, %c0_2] : memref<50x32xbf16, #tpu.memory_space<vmem>>, vector<50x32xbf16>
    %cst = arith.constant dense<0.000000e+00> : vector<50x128xf32>
    %3 = tpu.matmul %2, %1, %cst {dimension_numbers = #tpu.dot_dimension_numbers<[1], [1], [0], [0], [0, 0, 1, 0], [], []>} : vector<50x32xbf16>, vector<128x32xbf16>, vector<50x128xf32> -> vector<50x128xf32>
    %c0_3 = arith.constant 0 : index
    %c0_4 = arith.constant 0 : index
    %4 = vector.load %arg3[%c0_3, %c0_4] : memref<50x1xf32, #tpu.memory_space<vmem>>, vector<50x1xf32>
    %5 = vector.broadcast %4 : vector<50x1xf32> to vector<50x128xf32>
    %6 = arith.addf %3, %5 : vector<50x128xf32>
    %cst_5 = arith.constant 0.000000e+00 : f32
    %7 = vector.broadcast %cst_5 : f32 to vector<50x128xf32>
    %8 = arith.maximumf %6, %7 : vector<50x128xf32>
    %c0_6 = arith.constant 0 : index
    %c0_7 = arith.constant 0 : index
    %9 = vector.load %arg4[%c0_6, %c0_7] : memref<25x50xbf16, #tpu.memory_space<vmem>>, vector<25x50xbf16>
    %10 = arith.truncf %8 : vector<50x128xf32> to vector<50x128xbf16>
    %cst_8 = arith.constant dense<0.000000e+00> : vector<25x128xf32>
    %11 = tpu.matmul %9, %10, %cst_8 {dimension_numbers = #tpu.dot_dimension_numbers<[1], [0], [0], [1], [0, 0, 1, 1], [], []>} : vector<25x50xbf16>, vector<50x128xbf16>, vector<25x128xf32> -> vector<25x128xf32>
    %c0_9 = arith.constant 0 : index
    %c0_10 = arith.constant 0 : index
    %12 = vector.load %arg5[%c0_9, %c0_10] : memref<25x1xf32, #tpu.memory_space<vmem>>, vector<25x1xf32>
    %13 = vector.broadcast %12 : vector<25x1xf32> to vector<25x128xf32>
    %14 = arith.addf %11, %13 : vector<25x128xf32>
    %cst_11 = arith.constant 0.000000e+00 : f32
    %15 = vector.broadcast %cst_11 : f32 to vector<25x128xf32>
    %16 = arith.maximumf %14, %15 : vector<25x128xf32>
    %c0_12 = arith.constant 0 : index
    %c0_13 = arith.constant 0 : index
    %17 = vector.load %arg6[%c0_12, %c0_13] : memref<1x25xbf16, #tpu.memory_space<vmem>>, vector<1x25xbf16>
    %18 = arith.truncf %16 : vector<25x128xf32> to vector<25x128xbf16>
    %cst_14 = arith.constant dense<0.000000e+00> : vector<1x128xf32>
    %19 = tpu.matmul %17, %18, %cst_14 {dimension_numbers = #tpu.dot_dimension_numbers<[1], [0], [0], [1], [0, 0, 1, 1], [], []>} : vector<1x25xbf16>, vector<25x128xbf16>, vector<1x128xf32> -> vector<1x128xf32>
    %c0_15 = arith.constant 0 : index
    %c0_16 = arith.constant 0 : index
    %20 = vector.load %arg7[%c0_15, %c0_16] : memref<1x1xf32, #tpu.memory_space<vmem>>, vector<1x1xf32>
    %21 = vector.broadcast %20 : vector<1x1xf32> to vector<1x128xf32>
    %22 = arith.addf %19, %21 : vector<1x128xf32>
    %c0_17 = arith.constant 0 : index
    %c0_18 = arith.constant 0 : index
    %23 = vector.load %arg8[%c0_17, %c0_18] : memref<1x128xf32, #tpu.memory_space<vmem>>, vector<1x128xf32>
    tpu.vector_store %arg8[%c0_17, %c0_18], %22 {strides = array<i32>} : memref<1x128xf32, #tpu.memory_space<vmem>>, vector<1x128xf32>,
    return
  }
  func.func @transform_0(%arg0: i32) -> (i32, i32) {
    %c0_i32 = arith.constant 0 : i32
    %c0_i32_0 = arith.constant 0 : i32
    return %arg0, %c0_i32 : i32, i32
  }
  func.func @transform_1(%arg0: i32) -> (i32, i32) {
    %c0_i32 = arith.constant 0 : i32
    %c0_i32_0 = arith.constant 0 : i32
    %c0_i32_1 = arith.constant 0 : i32
    return %c0_i32, %c0_i32_0 : i32, i32
  }
  func.func @transform_2(%arg0: i32) -> (i32, i32) {
    %c0_i32 = arith.constant 0 : i32
    %c0_i32_0 = arith.constant 0 : i32
    %c0_i32_1 = arith.constant 0 : i32
    return %c0_i32, %c0_i32_0 : i32, i32
  }
  func.func @transform_3(%arg0: i32) -> (i32, i32) {
    %c0_i32 = arith.constant 0 : i32
    %c0_i32_0 = arith.constant 0 : i32
    %c0_i32_1 = arith.constant 0 : i32
    return %c0_i32, %c0_i32_0 : i32, i32
  }
  func.func @transform_4(%arg0: i32) -> (i32, i32) {
    %c0_i32 = arith.constant 0 : i32
    %c0_i32_0 = arith.constant 0 : i32
    %c0_i32_1 = arith.constant 0 : i32
    return %c0_i32, %c0_i32_0 : i32, i32
  }
  func.func @transform_5(%arg0: i32) -> (i32, i32) {
    %c0_i32 = arith.constant 0 : i32
    %c0_i32_0 = arith.constant 0 : i32
    %c0_i32_1 = arith.constant 0 : i32
    return %c0_i32, %c0_i32_0 : i32, i32
  }
  func.func @transform_6(%arg0: i32) -> (i32, i32) {
    %c0_i32 = arith.constant 0 : i32
    %c0_i32_0 = arith.constant 0 : i32
    %c0_i32_1 = arith.constant 0 : i32
    return %c0_i32, %c0_i32_0 : i32, i32
  }
  func.func @transform_7(%arg0: i32) -> (i32, i32) {
    %c0_i32 = arith.constant 0 : i32
    %c0_i32_0 = arith.constant 0 : i32
    return %c0_i32, %arg0 : i32, i32
  }
}

</mosaic_0001>

<bundles_post_ra>
// kernel: price_predictor_forward.1
= control target key start
LH: loop header
LB: loop body
LE: loop exit
PB: predicated region body
PF: predicated region fallthrough
CT: control target
= control target key end

     0   :  { %s558_s0 = inlined_call_operand.vmem [shape: f32[8,32], index: 0, kind: input, shape index: {}]   ;;  %s559_s1 = inlined_call_operand.vmem [shape: bf16[50,32], index: 1, kind: input, shape index: {}]   ;;  %s560_s2 = inlined_call_operand.vmem [shape: f32[50,1], index: 2, kind: input, shape index: {}]   ;;  %s561_s3 = inlined_call_operand.vmem [shape: bf16[25,50], index: 3, kind: input, shape index: {}]   ;;  %s562_s4 = inlined_call_operand.vmem [shape: f32[25,1], index: 4, kind: input, shape index: {}]   ;;  %s563_s5 = inlined_call_operand.vmem [shape: bf16[1,25], index: 5, kind: input, shape index: {}]   ;;  %s564_s6 = inlined_call_operand.<no memory space> [shape: f32[1,1], index: 6, kind: input, shape index: {}]   ;;  %s565_s7 = inlined_call_operand.hbm [shape: f32[1,8], index: 7, kind: output, shape index: {}]  }
   0x1   :  { %v12_v0 = vstv %s564_s6 }
   0x2   :  { %13 = vst [vmem:[#allocation2] sm:$0x1] %v12_v0 }
   0x3   :  { %v44_v1 = vld [vmem:[%s558_s0 + $0x70] sm:$0xff]  ;;  %v45_v2 = vld [vmem:[%s558_s0 + $0x78] sm:$0xff]  ;;  %vm121_vm0 = vcmask 261120   ;;  %v42_v4 = vld [vmem:[%s558_s0 + $0x60] sm:$0xff] }
   0x4   :  { %v53_v3 = vpack.c.bf16 %v45_v2, %v44_v1  ;;  %v43_v5 = vld [vmem:[%s558_s0 + $0x68] sm:$0xff] }
   0x6   :  { %v156_v6 = vsel %vm121_vm0, %v53_v3, 0 }
   0x7   :  { %14 = vsyncpa [#allocation4], 0  ;;  %352 = vmatpush.bf16.xpose.msra.mxu3 %v156_v6  ;;  %158 = vmatpush.bf16.xpose.msra.mxu0 %v156_v6  ;;  %v52_v7 = vpack.c.bf16 %v43_v5, %v42_v4  ;;  %v40_v9 = vld [vmem:[%s558_s0 + $0x50] sm:$0xff]  ;;  %v41_v10 = vld [vmem:[%s558_s0 + $0x58] sm:$0xff]  ;;  %v392_v25 = vmov 0   ;;  %vm242_vm1 = vcmask 1040384  }
   0x8   :  { %v51_v11 = vpack.c.bf16 %v41_v10, %v40_v9  ;;  %v38_v13 = vld [vmem:[%s558_s0 + $0x40] sm:$0xff]  ;;  %v39_v14 = vld [vmem:[%s558_s0 + $0x48] sm:$0xff]  ;;  %v36_v17 = vld [vmem:[%s558_s0 + $0x30] sm:$0xff]  ;;  %364 = vset.pattern.permute.xlu1 %v392_v25  ;;  %363 = vset.pattern.permute.xlu0 %v392_v25  ;;  %vm235_vm2 = vcmask 408576   ;;  %vm283_vm3 = vcmask 1043456   ;;  %vm284_vm4 = vcmask 1044480  }
   0x9   :  { %v153_v8 = vsel %vm121_vm0, %v52_v7, 0  ;;  %v50_v15 = vpack.c.bf16 %v39_v14, %v38_v13  ;;  %v37_v18 = vld [vmem:[%s558_s0 + $0x38] sm:$0xff]  ;;  %v34_v21 = vld [vmem:[%s558_s0 + $0x20] sm:$0xff]  ;;  %v35_v22 = vld [vmem:[%s558_s0 + $0x28] sm:$0xff]  ;;  %365 = vset.pattern.permute.xlu2 %v392_v25  ;;  %vm279_vm5 = vcmask 203776   ;;  %s394_s18 = smov [#allocation3]  }
   0xa   :  { %v150_v12 = vsel %vm121_vm0, %v51_v11, 0  ;;  %v49_v19 = vpack.c.bf16 %v37_v18, %v36_v17  ;;  %v66_v23 = vld [vmem:[%s560_s2 + $0x28] sm:$0xff]  ;;  %v48_v24 = vpack.c.bf16 %v35_v22, %v34_v21  ;;  %v32_v27 = vld [vmem:[%s558_s0 + $0x10] sm:$0xff]  ;;  %v33_v28 = vld [vmem:[%s558_s0 + $0x18] sm:$0xff]  ;;  %s309_s19 = sshll.u32 %s394_s18, 4  ;;  %s311_s22 = sshll.u32 %s565_s7, 4  ;;  %s310_s19 = int_to_ptr.vmem [resolvable:$true] %s309_s19  ;;  %s312_s22 = int_to_ptr.hbm [resolvable:$true] %s311_s22 }
   0xb   :  { %v147_v16 = vsel %vm121_vm0, %v50_v15, 0  ;;  %95 = vperm.xlu1 %364, %v66_v23   ;;  %v47_v29 = vpack.c.bf16 %v33_v28, %v32_v27  ;;  %v30_v31 = vld [vmem:[%s558_s0] sm:$0xff]  ;;  %v31_v32 = vld [vmem:[%s558_s0 + $0x8] sm:$0xff]  ;;  %v63_v33 = vld [vmem:[%s560_s2 + $0x10] sm:$0xff] }
   0xc   :  { %v144_v20 = vsel %vm121_vm0, %v49_v19, 0  ;;  %v141_v26 = vsel %vm121_vm0, %v48_v24, 0  ;;  %v67_v34 = vld [vmem:[%s560_s2 + $0x30] sm:$0x3]  ;;  %v46_v35 = vpack.c.bf16 %v31_v32, %v30_v31  ;;  %v65_v37 = vld [vmem:[%s560_s2 + $0x20] sm:$0xff]  ;;  %v348_v38 = vld [vmem:[%s559_s1 + $0x8] sm:$0xff] }
   0xd   :  { %v138_v30 = vsel %vm121_vm0, %v47_v29, 0  ;;  %100 = vperm.xlu0 %363, %v67_v34   ;;  %v347_v39 = vld [vmem:[%s559_s1] sm:$0xff]  ;;  %v62_v40 = vld [vmem:[%s560_s2 + $0x8] sm:$0xff]  ;;  %v203_v41 = vld [vmem:[%s562_s4 + $0x10] sm:$0xff]  ;;  %v393_v34 = vmov 65535  }
   0xe   :  { %v135_v36 = vsel %vm121_vm0, %v46_v35, 0  ;;  %v64_v42 = vld [vmem:[%s560_s2 + $0x18] sm:$0xff]  ;;  %v202_v43 = vld [vmem:[%s562_s4 + $0x8] sm:$0xff]  ;;  %v201_v44 = vld [vmem:[%s562_s4] sm:$0xff]  ;;  %v285_v35 = vsel %vm283_vm3, 4294967295, %v393_v34 }
   0xf   :  { %353 = vmatpush.bf16.xpose.msra.mxu3 %v153_v8  ;;  %159 = vmatpush.bf16.xpose.msra.mxu0 %v153_v8  ;;  %v61_v45 = vld [vmem:[%s560_s2] sm:$0xff]  ;;  %v349_v46 = vld [vmem:[%s559_s1 + $0x10] sm:$0xff]  ;;  %v204_v47 = vld [vmem:[%s562_s4 + $0x18] sm:$0x1] }
  0x10   :  { %85 = vperm.xlu2 %365, %v64_v42   ;;  %v60_v48 = vld [vmem:[%s559_s1 + $0x18] sm:$0x1]  ;;  %v272_v49 = vld [vmem:[#allocation2] sm:$0x1]  ;;  %v342_v23 = vld [vmem:[%s561_s3 + $0x8] sm:$0xf] }
  0x11   :  { %v116_v50 = vunpack.c.l.b16 %v60_v48  ;;  %v350_v22 = vld [vmem:[%s561_s3] sm:$0xff]  ;;  %v351_v24 = vld [vmem:[%s561_s3 + $0x8] sm:$0x10] }
  0x12   :  { %v343_v25 = vor.u32 %v351_v24, %v342_v23  ;;  %v269_v48 = vld [vmem:[%s563_s5] sm:$0x1] }
  0x13   :  { %80 = vperm.xlu1 %364, %v63_v33   ;;  %v120_v51 = vpack.c.b16 %v116_v50, %v116_v50 }
  0x15   :  { %90 = vperm.xlu0 %363, %v65_v37  }
  0x17   :  { %354 = vmatpush.bf16.xpose.msra.mxu3 %v150_v12  ;;  %160 = vmatpush.bf16.xpose.msra.mxu0 %v150_v12 }
  0x18   :  { %70 = vperm.xlu2 %365, %v61_v45  }
  0x1b   :  { %217 = vperm.xlu1 %364, %v203_v41   ;;  %v286_v41 = vsel %vm284_vm4, %v285_v35, 0 }
  0x1d   :  { %75 = vperm.xlu0 %363, %v62_v40  }
  0x1f   :  { %355 = vmatpush.bf16.xpose.msra.mxu3 %v147_v16  ;;  %161 = vmatpush.bf16.xpose.msra.mxu0 %v147_v16 }
  0x20   :  { %222 = vperm.xlu2 %365, %v204_v47  }
  0x23   :  { %212 = vperm.xlu1 %364, %v202_v43  }
  0x25   :  { %207 = vperm.xlu0 %363, %v201_v44  }
  0x27   :  { %356 = vmatpush.bf16.xpose.msra.mxu3 %v144_v20  ;;  %162 = vmatpush.bf16.xpose.msra.mxu0 %v144_v20 }
  0x28   :  { %275 = vperm.xlu2 %365, %v272_v49  }
  0x2f   :  { %357 = vmatpush.bf16.xpose.msra.mxu3 %v141_v26  ;;  %163 = vmatpush.bf16.xpose.msra.mxu0 %v141_v26 }
  0x37   :  { %358 = vmatpush.bf16.xpose.msra.mxu3 %v138_v30  ;;  %164 = vmatpush.bf16.xpose.msra.mxu0 %v138_v30 }
  0x3f   :  { %359 = vmatpush.bf16.xpose.msra.mxu3 %v135_v36  ;;  %165 = vmatpush.bf16.xpose.msra.mxu0 %v135_v36 }
  0x46   :  { %333 = vmatmul.msk.bf16.vlgmr.msra.gmra.mxu3 %vm121_vm0, %v348_v38  ;;  %332 = vmatmul.msk.bf16.vlgmr.msra.gmra.mxu0 %vm121_vm0, %v347_v39 }
  0x56   :  { %334 = vmatmul.msk.bf16.gmra.mxu3 %vm121_vm0, %v349_v46 }
  0x66   :  { %335 = vmatmul.msk.bf16.gmra.mxu3 %vm121_vm0, %v120_v51 }
  0x6a   :  { %v86_v61 = vpop.permute.xlu2 %85 }
  0x72   :  { %v71_v12 = vpop.permute.xlu2 %70 }
  0x7a   :  { %v223_v31 = vpop.permute.xlu2 %222 }
  0x7d   :  { %v96_v57 = vpop.permute.xlu1 %95 }
  0x7f   :  { %v101_v55 = vpop.permute.xlu0 %100 }
  0x82   :  { %v276_v49 = vpop.permute.xlu2 %275 }
  0x83   :  { %v278_v50 = vperm.slane %v276_v49, 0 }
  0x85   :  { %v81_v2 = vpop.permute.xlu1 %80 }
  0x87   :  { %v91_v59 = vpop.permute.xlu0 %90 }
  0x8d   :  { %v218_v28 = vpop.permute.xlu1 %217 }
  0x8f   :  { %v76_v11 = vpop.permute.xlu0 %75 }
  0x95   :  { %v213_v36 = vpop.permute.xlu1 %212 }
  0x97   :  { %v208_v40 = vpop.permute.xlu0 %207 }
  0xc3   :  { %v167_v58 = vpop.f32.mrf.mxu0 }
  0xc4   :  { %v168_v14 = vadd.f32 %v167_v58, %v71_v12 }
  0xc6   :  { %v186_v18 = vmax.f32 %v168_v14, 0.0 }
  0xc9   :  { %v172_v52 = vpop.f32.mrf.mxu3 }
  0xca   :  { %v173_v8 = vadd.f32 %v172_v52, %v81_v2 }
  0xcb   :  { %v169_v6 = vpop.f32.mrf.mxu0 }
  0xcc   :  { %v170_v15 = vadd.f32 %v169_v6, %v76_v11  ;;  %v188_v17 = vmax.f32 %v173_v8, 0.0 }
  0xce   :  { %v187_v19 = vmax.f32 %v170_v15, 0.0 }
  0xd0   :  { %v197_v21 = vpack.c.bf16 %v187_v19, %v186_v18 }
  0xd1   :  { %v174_v53 = vpop.f32.mrf.mxu3 }
  0xd2   :  { %v175_v4 = vadd.f32 %v174_v53, %v86_v61 }
  0xd4   :  { %v189_v13 = vmax.f32 %v175_v4, 0.0 }
  0xd6   :  { %v198_v20 = vpack.c.bf16 %v189_v13, %v188_v17 }
  0xd9   :  { %v177_v54 = vpop.f32.mrf.mxu3 }
  0xda   :  { %v178_v1 = vadd.f32 %v177_v54, %v91_v59 }
  0xdc   :  { %v190_v9 = vmax.f32 %v178_v1, 0.0 }
  0xe1   :  { %v179_v56 = vpop.f32.mrf.mxu3 }
  0xe2   :  { %v180_v63 = vadd.f32 %v179_v56, %v96_v57 }
  0xe4   :  { %v191_v5 = vmax.f32 %v180_v63, 0.0 }
  0xe6   :  { %v199_v16 = vpack.c.bf16 %v191_v5, %v190_v9 }
  0xe9   :  { %v182_v60 = vpop.f32.mrf.mxu3 }
  0xea   :  { %v183_v62 = vadd.f32 %v182_v60, %v101_v55 }
  0xec   :  { %v192_v0 = vmax.f32 %v183_v62, 0.0 }
  0xee   :  { %v200_v3 = vpack.c.bf16 %v192_v0, %v192_v0 }
  0xf0   :  { %v244_v7 = vsel %vm242_vm1, %v200_v3, 0 }
  0xf1   :  { %v184_v10 = vpop.f32.mrf.mxu3  ;;  %250 = vmatpush.bf16.msra.mxu1 %v244_v7 }
  0xf5   :  { %251 = vmatpush.bf16.msra.mxu1 %v199_v16 }
  0xf9   :  { %252 = vmatpush.bf16.msra.mxu1 %v198_v20 }
  0xfd   :  { %253 = vmatpush.bf16.msra.mxu1 %v197_v21 }
 0x100   :  { %344 = vmatmul.msk.bf16.vlgmr.msra.gmra.mxu1 %vm235_vm2, %v350_v22 }
 0x110   :  { %345 = vmatmul.msk.bf16.gmra.mxu1 %vm235_vm2, %v343_v25 }
 0x17d   :  { %v255_v26 = vpop.f32.mrf.mxu1 }
 0x17e   :  { %v256_v42 = vadd.f32 %v255_v26, %v208_v40 }
 0x180   :  { %v265_v46 = vmax.f32 %v256_v42, 0.0 }
 0x185   :  { %v257_v27 = vpop.f32.mrf.mxu1 }
 0x186   :  { %v258_v37 = vadd.f32 %v257_v27, %v213_v36 }
 0x188   :  { %v266_v44 = vmax.f32 %v258_v37, 0.0 }
 0x18a   :  { %v270_v47 = vpack.c.bf16 %v266_v44, %v265_v46 }
 0x18d   :  { %v260_v29 = vpop.f32.mrf.mxu1 }
 0x18e   :  { %v261_v30 = vadd.f32 %v260_v29, %v218_v28 }
 0x190   :  { %v267_v38 = vmax.f32 %v261_v30, 0.0 }
 0x195   :  { %v262_v32 = vpop.f32.mrf.mxu1 }
 0x196   :  { %v263_v33 = vadd.f32 %v262_v32, %v223_v31 }
 0x198   :  { %v268_v39 = vmax.f32 %v263_v33, 0.0 }
 0x19a   :  { %v271_v43 = vpack.c.bf16 %v268_v39, %v267_v38 }
 0x19c   :  { %v288_v45 = vand.u32 %v286_v41, %v271_v43 }
 0x19e   :  { %296 = vmatpush.bf16.msra.mxu2 %v288_v45 }
 0x1a2   :  { %297 = vmatpush.bf16.msra.mxu2 %v270_v47 }
 0x1a5   :  { %346 = vmatmul.msk.bf16.vlgmr.msra.gmra.mxu2 %vm279_vm5, %v269_v48 }
 0x228   :  { %v299_v51 = vpop.f32.mrf.mxu2 }
 0x229   :  { %v300_v52 = vadd.f32 %v299_v51, %v278_v50 }
 0x22b   :  { %303 = vst [vmem:[#allocation3] sm:$0x1] %v300_v52 }
 0x22c   :  { %314 = dma.vmem_to_hbm [thread:$0]  %s310_s19, 16, %s312_s22, [#allocation4]  }
 0x230   :  { %v301_v53 = vpop.f32.mrf.mxu2 }
 0x231   :  { %390 = dma.done.wait [#allocation4], 16  }
 0x232   :  { %391 = vsyncadd [#allocation4], 4294967280 }
 0x233   :  { %319 = vsyncpa [#allocation4], 1 }

</bundles_post_ra>
